<compile_context>
chip_gen: v7x
topology: tpu7x:2x2x1
jax: 0.10.0
libtpu: 0.0.40
codegen_flags: <defaults>
</compile_context>

<pallas_src>
import jax
import jax.numpy as jnp
from jax.experimental import pallas as pl
from jax.experimental.pallas import tpu as pltpu


def projfc_kernel(x_ref, w1_ref, b1_ref, w2_ref, b2_ref, out_ref):
    # x: (TB, D) in its native dtype, w1: (D, P) bf16, b1: (1, P) f32,
    # w2: (P, C) bf16, b2: (1, C) f32, out: (TB, C) out_dtype.
    x = x_ref[...].astype(w1_ref.dtype)                                 # in-kernel cast (VPU)
    h = jnp.dot(x, w1_ref[...], preferred_element_type=jnp.float32)     # MXU, f32 acc
    h = jnp.maximum(h + b1_ref[...], 0.0)                               # f32 bias + ReLU
    y = jnp.dot(h.astype(w2_ref.dtype), w2_ref[...],
                preferred_element_type=jnp.float32)                     # MXU, f32 acc
    out_ref[...] = (y + b2_ref[...]).astype(out_ref.dtype)              # unpadded store


def prepare_params(w1, b1, w2, b2, *, compute_dtype=jnp.bfloat16):
    """One-time parameter prep (outside the hot path).

    w1: (P, D), b1: (P,), w2: (C, P), b2: (C,)  -- torch nn.Linear layout.
    Returns (in, out)-layout weights in compute_dtype and f32 row-vector
    biases.  No class-dim padding: the kernel writes the true (B, C) output.
    """
    P, D = w1.shape
    C, _ = w2.shape
    return {
        "w1": jnp.transpose(w1).astype(compute_dtype),    # (D, P)
        "b1": b1.reshape(1, P).astype(jnp.float32),       # (1, P)
        "w2": jnp.transpose(w2).astype(compute_dtype),    # (P, C)
        "b2": b2.reshape(1, C).astype(jnp.float32),       # (1, C)
    }


def projfc_head(x, params, *, block_b=8192, out_dtype=jnp.float32):
    """Forward pass: fc(relu(projection(x))).  x: (B, D) -> (B, num_classes).

    block_b: rows per grid step (multiple of 8; sweep 2048-8192).
    out_dtype: float32 matches the torch module; bfloat16 halves output HBM
               bytes if the consumer (loss/argmax) tolerates bf16 logits.
    """
    w1, b1, w2, b2 = params["w1"], params["b1"], params["w2"], params["b2"]
    B, D = x.shape
    P = w1.shape[1]
    C = w2.shape[1]

    # Full batch in one block if small, else block_b rows per grid step.
    # Ragged tails are handled by Pallas boundary-block masking (row-wise op:
    # garbage in out-of-bounds rows never contaminates valid rows, and their
    # writes are masked), so no jnp.pad copy pass is needed.
    tb = B if B <= block_b else block_b
    num_tiles = pl.cdiv(B, tb)

    resident = lambda shape: pl.BlockSpec(shape, lambda i: (0, 0))

    itemsize = lambda a: jnp.dtype(a.dtype).itemsize
    cost = pl.CostEstimate(
        flops=2 * B * (D * P + P * C),
        transcendentals=0,
        bytes_accessed=(B * D * itemsize(x)
                        + w1.size * itemsize(w1) + b1.size * itemsize(b1)
                        + w2.size * itemsize(w2) + b2.size * itemsize(b2)
                        + B * C * jnp.dtype(out_dtype).itemsize),
    )

    return pl.pallas_call(
        projfc_kernel,
        out_shape=jax.ShapeDtypeStruct((B, C), out_dtype),
        grid=(num_tiles,),
        in_specs=[
            pl.BlockSpec((tb, D), lambda i: (i, 0)),   # x streamed per grid step
            resident((D, P)),                          # w1: VMEM-resident
            resident((1, P)),                          # b1
            resident((P, C)),                          # w2
            resident((1, C)),                          # b2
        ],
        out_specs=pl.BlockSpec((tb, C), lambda i: (i, 0)),
        compiler_params=pltpu.CompilerParams(
            dimension_semantics=("parallel",)),        # megacore split on v7x
        cost_estimate=cost,
    )(x, w1, b1, w2, b2)


def init_linear(key, out_features, in_features, dtype=jnp.float32):
    """Deterministic PyTorch-style Linear init: U(-1/sqrt(fan_in), 1/sqrt(fan_in))."""
    kw, kb = jax.random.split(key)
    bound = 1.0 / jnp.sqrt(jnp.array(in_features, dtype))
    w = jax.random.uniform(kw, (out_features, in_features), dtype, -bound, bound)
    b = jax.random.uniform(kb, (out_features,), dtype, -bound, bound)
    return w, b


if __name__ == "__main__":
    # Small shapes consistent with the module: latent_dim=32, proj=64, classes=16.
    B, latent_dim, num_proj, num_classes = 8, 32, 64, 16

    key = jax.random.PRNGKey(0)
    kx, k1, k2 = jax.random.split(key, 3)

    x = jax.random.normal(kx, (B, latent_dim), jnp.float32)
    w1, b1 = init_linear(k1, num_proj, latent_dim)      # projection Linear
    w2, b2 = init_linear(k2, num_classes, num_proj)     # fc Linear

    params = prepare_params(w1, b1, w2, b2)             # one-time prep
    out = jax.block_until_ready(projfc_head(x, params))
    assert out.shape == (B, num_classes) and out.dtype == jnp.float32

    # Reference in the same precision regime (bf16 matmul inputs, f32 epilogue).
    xb = x.astype(jnp.bfloat16)
    h_ref = jnp.maximum(
        jnp.dot(xb, w1.T.astype(jnp.bfloat16), preferred_element_type=jnp.float32) + b1,
        0.0)
    ref = jnp.dot(h_ref.astype(jnp.bfloat16), w2.T.astype(jnp.bfloat16),
                  preferred_element_type=jnp.float32) + b2
    assert jnp.allclose(out, ref, atol=2e-2, rtol=2e-2)

    # Sanity check against exact f32 math with bf16-appropriate tolerance.
    ref_f32 = jnp.maximum(x @ w1.T + b1, 0.0) @ w2.T + b2
    assert jnp.allclose(out, ref_f32, atol=5e-2, rtol=5e-2)

    # Exercise the multi-tile + ragged-tail path (boundary-block masking).
    B2 = 20
    x2 = jax.random.normal(jax.random.PRNGKey(1), (B2, latent_dim), jnp.float32)
    out2 = jax.block_until_ready(projfc_head(x2, params, block_b=8))
    ref2 = jnp.maximum(x2 @ w1.T + b1, 0.0) @ w2.T + b2
    assert out2.shape == (B2, num_classes)
    assert jnp.allclose(out2, ref2, atol=5e-2, rtol=5e-2)

    # Exercise the bf16-output option (halves write bytes for HBM-bound batches).
    out_bf16 = jax.block_until_ready(projfc_head(x, params, out_dtype=jnp.bfloat16))
    assert out_bf16.shape == (B, num_classes) and out_bf16.dtype == jnp.bfloat16
    assert jnp.allclose(out_bf16.astype(jnp.float32), ref_f32, atol=1e-1, rtol=1e-1)

    # TODO(synk): projection=None / use_clf=False / return_penult_feat_and_pred
    # config branches are trivial wrapper variations and are not exercised here.

    print("KERNEL_OK")
</pallas_src>

<mosaic_0001>
module attributes {stable_mosaic.version = 11 : i64} {
  func.func @projfc_kernel(%arg0: i32, %arg1: memref<8x32xf32, #tpu.memory_space<vmem>>, %arg2: memref<32x64xbf16, #tpu.memory_space<vmem>>, %arg3: memref<1x64xf32, #tpu.memory_space<vmem>>, %arg4: memref<64x16xbf16, #tpu.memory_space<vmem>>, %arg5: memref<1x16xf32, #tpu.memory_space<vmem>>, %arg6: memref<8x16xf32, #tpu.memory_space<vmem>>) attributes {dimension_semantics = [#tpu.dimension_semantics<parallel>], iteration_bounds = array<i64: 1>, scalar_prefetch = 0 : i64, scratch_operands = 0 : i64, tpu.core_type = #tpu.core_type<tc>, window_params = [{transform_indices = @transform_0, window_bounds = array<i64: 8, 32>}, {pipeline_mode = #tpu.pipeline_mode<synchronous>, transform_indices = @transform_1, window_bounds = array<i64: 32, 64>}, {pipeline_mode = #tpu.pipeline_mode<synchronous>, transform_indices = @transform_2, window_bounds = array<i64: 1, 64>}, {pipeline_mode = #tpu.pipeline_mode<synchronous>, transform_indices = @transform_3, window_bounds = array<i64: 64, 16>}, {pipeline_mode = #tpu.pipeline_mode<synchronous>, transform_indices = @transform_4, window_bounds = array<i64: 1, 16>}, {transform_indices = @transform_5, window_bounds = array<i64: 8, 16>}]} {
    %c0 = arith.constant 0 : index
    %c0_0 = arith.constant 0 : index
    %0 = vector.load %arg1[%c0, %c0_0] : memref<8x32xf32, #tpu.memory_space<vmem>>, vector<8x32xf32>
    %1 = arith.truncf %0 : vector<8x32xf32> to vector<8x32xbf16>
    %c0_1 = arith.constant 0 : index
    %c0_2 = arith.constant 0 : index
    %2 = vector.load %arg2[%c0_1, %c0_2] : memref<32x64xbf16, #tpu.memory_space<vmem>>, vector<32x64xbf16>
    %cst = arith.constant dense<0.000000e+00> : vector<8x64xf32>
    %3 = tpu.matmul %1, %2, %cst {dimension_numbers = #tpu.dot_dimension_numbers<[1], [0], [0], [1], [0, 0, 1, 1], [], []>} : vector<8x32xbf16>, vector<32x64xbf16>, vector<8x64xf32> -> vector<8x64xf32>
    %c0_3 = arith.constant 0 : index
    %c0_4 = arith.constant 0 : index
    %4 = vector.load %arg3[%c0_3, %c0_4] : memref<1x64xf32, #tpu.memory_space<vmem>>, vector<1x64xf32>
    %5 = vector.broadcast %4 : vector<1x64xf32> to vector<8x64xf32>
    %6 = arith.addf %3, %5 : vector<8x64xf32>
    %cst_5 = arith.constant 0.000000e+00 : f32
    %7 = vector.broadcast %cst_5 : f32 to vector<8x64xf32>
    %8 = arith.maximumf %6, %7 : vector<8x64xf32>
    %9 = arith.truncf %8 : vector<8x64xf32> to vector<8x64xbf16>
    %c0_6 = arith.constant 0 : index
    %c0_7 = arith.constant 0 : index
    %10 = vector.load %arg4[%c0_6, %c0_7] : memref<64x16xbf16, #tpu.memory_space<vmem>>, vector<64x16xbf16>
    %cst_8 = arith.constant dense<0.000000e+00> : vector<8x16xf32>
    %11 = tpu.matmul %9, %10, %cst_8 {dimension_numbers = #tpu.dot_dimension_numbers<[1], [0], [0], [1], [0, 0, 1, 1], [], []>} : vector<8x64xbf16>, vector<64x16xbf16>, vector<8x16xf32> -> vector<8x16xf32>
    %c0_9 = arith.constant 0 : index
    %c0_10 = arith.constant 0 : index
    %12 = vector.load %arg5[%c0_9, %c0_10] : memref<1x16xf32, #tpu.memory_space<vmem>>, vector<1x16xf32>
    %13 = vector.broadcast %12 : vector<1x16xf32> to vector<8x16xf32>
    %14 = arith.addf %11, %13 : vector<8x16xf32>
    %c0_11 = arith.constant 0 : index
    %c0_12 = arith.constant 0 : index
    %15 = vector.load %arg6[%c0_11, %c0_12] : memref<8x16xf32, #tpu.memory_space<vmem>>, vector<8x16xf32>
    tpu.vector_store %arg6[%c0_11, %c0_12], %14 {strides = array<i32>} : memref<8x16xf32, #tpu.memory_space<vmem>>, vector<8x16xf32>,
    return
  }
  func.func @transform_0(%arg0: i32) -> (i32, i32) {
    %c0_i32 = arith.constant 0 : i32
    %c0_i32_0 = arith.constant 0 : i32
    return %arg0, %c0_i32 : i32, i32
  }
  func.func @transform_1(%arg0: i32) -> (i32, i32) {
    %c0_i32 = arith.constant 0 : i32
    %c0_i32_0 = arith.constant 0 : i32
    %c0_i32_1 = arith.constant 0 : i32
    return %c0_i32, %c0_i32_0 : i32, i32
  }
  func.func @transform_2(%arg0: i32) -> (i32, i32) {
    %c0_i32 = arith.constant 0 : i32
    %c0_i32_0 = arith.constant 0 : i32
    %c0_i32_1 = arith.constant 0 : i32
    return %c0_i32, %c0_i32_0 : i32, i32
  }
  func.func @transform_3(%arg0: i32) -> (i32, i32) {
    %c0_i32 = arith.constant 0 : i32
    %c0_i32_0 = arith.constant 0 : i32
    %c0_i32_1 = arith.constant 0 : i32
    return %c0_i32, %c0_i32_0 : i32, i32
  }
  func.func @transform_4(%arg0: i32) -> (i32, i32) {
    %c0_i32 = arith.constant 0 : i32
    %c0_i32_0 = arith.constant 0 : i32
    %c0_i32_1 = arith.constant 0 : i32
    return %c0_i32, %c0_i32_0 : i32, i32
  }
  func.func @transform_5(%arg0: i32) -> (i32, i32) {
    %c0_i32 = arith.constant 0 : i32
    %c0_i32_0 = arith.constant 0 : i32
    return %arg0, %c0_i32 : i32, i32
  }
}

</mosaic_0001>

<bundles_post_ra>
// kernel: tpu_custom_call.1
= control target key start
LH: loop header
LB: loop body
LE: loop exit
PB: predicated region body
PF: predicated region fallthrough
CT: control target
= control target key end

     0   :  { %v263_v1 = vmov 0.0   ;;  %vm264_vm0 = vmmov 0   ;;  %vm47_vm1 = vcmask 261120   ;;  %s335_s0 = inlined_call_operand.vmem [shape: f32[8,32], index: 0, kind: input, shape index: {}]   ;;  %s336_s1 = inlined_call_operand.vmem [shape: bf16[32,64], index: 1, kind: input, shape index: {}]   ;;  %s337_s2 = inlined_call_operand.vmem [shape: f32[1,64], index: 2, kind: input, shape index: {}]   ;;  %s338_s3 = inlined_call_operand.vmem [shape: bf16[64,16], index: 3, kind: input, shape index: {}]   ;;  %s339_s4 = inlined_call_operand.vmem [shape: f32[1,16], index: 4, kind: input, shape index: {}]   ;;  %s340_s5 = inlined_call_operand.hbm [shape: f32[8,16], index: 5, kind: output, shape index: {}]  }
   0x1   :  { %v233_v0 = vld [vmem:[%s336_s1] sm:$0xff]   ;;  %210 = vmatprep.subr.bf16.mxu0 %v263_v1  ;;  %v234_v2 = vld [vmem:[%s336_s1 + $0x8] sm:$0xff]   ;;  %218 = vmatprep.subr.bf16.mxu1 %v263_v1 }
   0x2   :  { %211 = vmatpush3.bf16.msra.mxu0 %v233_v0  ;;  %214 = vmatprep.mubr.msk.bf16.mxu0 %vm264_vm0, %v263_v1  ;;  %v22_v3 = vld [vmem:[%s335_s0] sm:$0xff]  ;;  %v236_v5 = vld [vmem:[%s338_s3 + $0x8] sm:$0xff]  }
   0x3   :  { %212 = vmatprep.subr.bf16.mxu0 %v263_v1  ;;  %v235_v4 = vld [vmem:[%s338_s3] sm:$0xff]   ;;  %226 = vmatprep.mubr.msk.bf16.mxu1 %vm264_vm0, %v263_v1  ;;  %v23_v6 = vpack.c.bf16 %v22_v3, %v22_v3 }
   0x4   :  { %219 = vmatpush3.bf16.msra.mxu1 %v235_v4 }
   0x5   :  { %220 = vmatprep.subr.bf16.mxu1 %v263_v1 }
   0x6   :  { %213 = vmatpush3.bf16.msra.mxu0 %v234_v2 }
   0x7   :  { %10 = vsyncpa [#allocation3], 0  ;;  %v237_v7 = vld [vmem:[%s338_s3 + $0x10] sm:$0xff]   ;;  %v238_v8 = vld [vmem:[%s338_s3 + $0x18] sm:$0xff]   ;;  %vm132_vm2 = vcmask 523264   ;;  %s265_s9 = smov [#allocation2]  }
   0x8   :  { %221 = vmatpush3.bf16.msra.mxu1 %v236_v5  ;;  %v192_v9 = vld [vmem:[%s337_s2] ss:$0 sm:$0xff]  ;;  %s184_s3 = sshll.u32 %s265_s9, 4  ;;  %vm176_vm3 = vcmask 130048   ;;  %s185_s3 = int_to_ptr.vmem [resolvable:$true] %s184_s3 }
   0x9   :  { %215 = vmatmul.mubr.msk.bf16.vlgmr.msra.gmra.mrb[0].mxu0 %vm47_vm1, %v23_v6  ;;  %222 = vmatprep.subr.bf16.mxu1 %v263_v1  ;;  %v196_v17 = vld [vmem:[%s339_s4] ss:$0 sm:$0xff]  ;;  %s239_s2 = scalar_lea.vmem %s185_s3, 128  ;;  %p244_p1 = scmp.lt.s32.totalorder %s185_s3, %s185_s3 }
   0xa   :  { %p240_p0 = scmp.ne.s32.totalorder %s185_s3, %s239_s2  ;;  %p245_p2 = scmp.lt.s32.totalorder %s239_s2, %s239_s2 }
   0xc   :  { %223 = vmatpush3.bf16.msra.mxu1 %v237_v7  ;;  %p246_p3 = por %p245_p2, %p244_p1 }
   0xd   :  { %224 = vmatprep.subr.bf16.mxu1 %v263_v1 }
   0xe   :  { %p247_p4 = pnand %p246_p3, %p240_p0 }
  0x10   :  { %225 = vmatpush3.bf16.msra.mxu1 %v238_v8 }
  0xdc   :  { %v85_v10 = vpop.f32.mrb[0].mxu0 }
  0xdd   :  { %v86_v11 = vadd.f32 %v192_v9, %v85_v10  ;;  %v216_v12 = vpop.f32.mrb[1].mxu0 }
  0xde   :  { %v88_v13 = vpop.f32.mrb[2].mxu0 }
  0xdf   :  { %v91_v14 = vmax.f32 %v86_v11, 0.0  ;;  %v217_v15 = vpop.f32.mrb[3].mxu0 }
  0xe1   :  { %v92_v16 = vpack.c.bf16 %v91_v14, %v91_v14 }
  0xe3   :  { %227 = vmatmul.mubr.msk.bf16.vlgmr.msra.gmra.mrb[0].mxu1 %vm132_vm2, %v92_v16 }
 0x1b6   :  { %v170_v18 = vpop.f32.mrb[0].mxu1 }
 0x1b7   :  { %v171_v19 = vadd.f32 %v196_v17, %v170_v18  ;;  %v228_v20 = vpop.f32.mrb[1].mxu1 }
 0x1b8   :  { %v173_v21 = vpop.f32.mrb[2].mxu1 }
 0x1b9   :  { %v229_v22 = vpop.f32.mrb[3].mxu1  ;;  %177 = vst.msk [vmem:[#allocation2] sm:$0xff] %vm176_vm3, %v171_v19 }
 0x1ba   :  { %250 = shalt.err (!%p247_p4)
}
 0x1bb   :  { %s251_s4 = scalar_lea.hbm %s340_s5, 128 }
 0x1bc   :  { %p252_p5 = scmp.ne.s32.totalorder %s340_s5, %s251_s4  ;;  %p255_p6 = scmp.lt.u32.totalorder %s251_s4, %s340_s5 }
 0x1be   :  { %p257_p7 = pnand %p255_p6, %p252_p5 }
 0x1c0   :  { %260 = shalt.err (!%p257_p7)
}
 0x1c1   :  { %187 = dma.vmem_to_hbm [thread:$0]  %s185_s3, 128, %s340_s5, [#allocation3]  }
 0x1c2   :  { %261 = dma.done.wait [#allocation3], 128  }
 0x1c3   :  { %262 = vsyncadd [#allocation3], 4294967168 }
 0x1c4   :  { %191 = vsyncpa [#allocation3], 1 }

</bundles_post_ra>
